<compile_context>
chip_gen: v7x
topology: tpu7x:2x2x1
jax: 0.10.0
libtpu: 0.0.40
codegen_flags: <defaults>
</compile_context>

<pallas_src>
import math
from datetime import datetime, timezone

import jax
import jax.numpy as jnp
from jax import lax
from jax.experimental import pallas as pl
from jax.experimental.pallas import tpu as pltpu

D_MODEL = 32
MIN_YEAR, MAX_YEAR = 2000, 2050
N_YEAR = MAX_YEAR - MIN_YEAR + 1          # 51
N_MONTH, N_DOW, N_HOUR = 12, 7, 24
N_TOTAL = N_YEAR + N_MONTH + N_DOW + N_HOUR   # 94
VOCAB_PAD = 128                               # pad fused vocab to one MXU K-pass


# ----------------------------- Pallas kernel --------------------------------
def _tse_kernel(idx_ref, tab_ref, out_ref):
    """Fused gather: one-hot [TB,128] x block-diagonal table [128,d] -> [TB,d].

    idx_ref: [TB, 4] int32 combined-offset indices (yi, 51+mi, 63+di, 70+hi)
    tab_ref: [128, d_model] float32 fused block-diagonal embedding table
    out_ref: [TB, d_model] float32
    """
    tb = out_ref.shape[0]
    vocab = tab_ref.shape[0]
    idx = idx_ref[...]
    # Single iota reused for all four compares.
    iota = lax.broadcasted_iota(jnp.int32, (tb, vocab), 1)
    # Four ones per row over disjoint column ranges -> one one-hot matrix.
    onehot = ((iota == idx[:, 0:1]) | (iota == idx[:, 1:2])
              | (iota == idx[:, 2:3]) | (iota == idx[:, 3:4]))
    # One MXU pass (K=128) per tile and one full-tile store.
    out_ref[...] = jnp.dot(onehot.astype(jnp.float32), tab_ref[...],
                           preferred_element_type=jnp.float32)


# ----------------------------- JAX glue --------------------------------------
def _decompose_utc(timestamps):
    """Unix seconds (int32, UTC) -> (year-2000, month-1, weekday, hour)."""
    ts = timestamps.astype(jnp.int32)
    days = ts // 86400
    secs = ts - days * 86400
    hour = secs // 3600
    dow = (days + 3) % 7                       # 1970-01-01 was Thursday (=3)
    # Howard Hinnant's civil-from-days algorithm.
    z = days + 719468
    era = z // 146097
    doe = z - era * 146097
    yoe = (doe - doe // 1460 + doe // 36524 - doe // 146096) // 365
    y = yoe + era * 400
    doy = doe - (365 * yoe + yoe // 4 - yoe // 100)
    mp = (5 * doy + 2) // 153
    m = mp + jnp.where(mp < 10, 3, -9)
    y = y + (m <= 2).astype(jnp.int32)
    return y - MIN_YEAR, m - 1, dow, hour


def _round_up(x, m):
    return (x + m - 1) // m * m


def fuse_tables(tables):
    """Concatenate the 4 tables into one block-diagonal [128, d_model] table.

    Call ONCE at init (it is a pure function of the parameters), not per step.
    """
    d4 = tables[0].shape[1]
    d_model = 4 * d4
    fused = jnp.zeros((VOCAB_PAD, d_model), jnp.float32)
    off = 0
    for k, tab in enumerate(tables):
        fused = fused.at[off:off + tab.shape[0], k * d4:(k + 1) * d4].set(
            tab.astype(jnp.float32))
        off += tab.shape[0]
    return fused


def timestamp_embedding(timestamps, fused_table, *, block_b=512):
    """Forward pass: [B] unix seconds -> [B, d_model] concatenated embeddings."""
    d_model = fused_table.shape[1]
    b = timestamps.shape[0]

    yi, mi, di, hi = _decompose_utc(timestamps)
    # Clamp OOB indices (nn.Embedding would raise); keeps every lookup inside
    # its own block of the fused table.
    yi = jnp.clip(yi, 0, N_YEAR - 1)
    mi = jnp.clip(mi, 0, N_MONTH - 1)
    di = jnp.clip(di, 0, N_DOW - 1)
    hi = jnp.clip(hi, 0, N_HOUR - 1)
    idx = jnp.stack(
        [yi,
         N_YEAR + mi,
         N_YEAR + N_MONTH + di,
         N_YEAR + N_MONTH + N_DOW + hi],
        axis=-1).astype(jnp.int32)                              # [B, 4]

    # Batch tiling: amortize per-step overhead, keep VMEM bounded, and let the
    # parallel grid axis shard batch tiles across TensorCores (v7x megacore).
    tb = min(block_b, _round_up(b, 8))
    b_pad = _round_up(b, tb)
    if b_pad != b:
        idx = jnp.pad(idx, ((0, b_pad - b), (0, 0)))  # pad rows sliced off below

    cost = pl.CostEstimate(
        flops=2 * b_pad * VOCAB_PAD * d_model,
        transcendentals=0,
        bytes_accessed=(idx.size + fused_table.size + b_pad * d_model) * 4)

    out = pl.pallas_call(
        _tse_kernel,
        out_shape=jax.ShapeDtypeStruct((b_pad, d_model), jnp.float32),
        grid_spec=pltpu.PrefetchScalarGridSpec(
            num_scalar_prefetch=0,
            grid=(b_pad // tb,),
            in_specs=[
                pl.BlockSpec((tb, 4), lambda i: (i, 0)),               # indices tile
                pl.BlockSpec((VOCAB_PAD, d_model), lambda i: (0, 0)),  # table (resident)
            ],
            out_specs=pl.BlockSpec((tb, d_model), lambda i: (i, 0)),
        ),
        compiler_params=pltpu.CompilerParams(
            dimension_semantics=("parallel",)),
        cost_estimate=cost,
    )(idx, fused_table)
    return out[:b]


def init_tables(key):
    """Xavier-uniform init matching nn.init.xavier_uniform_ on [vocab, d/4]."""
    def xavier(k, shape):
        fan_out, fan_in = shape[0], shape[1]
        bound = math.sqrt(6.0 / (fan_in + fan_out))
        return jax.random.uniform(k, shape, jnp.float32, -bound, bound)

    k1, k2, k3, k4 = jax.random.split(key, 4)
    d4 = D_MODEL // 4
    return (xavier(k1, (N_YEAR, d4)),
            xavier(k2, (N_MONTH, d4)),
            xavier(k3, (N_DOW, d4)),
            xavier(k4, (N_HOUR, d4)))


def _reference(tables, timestamps):
    yi, mi, di, hi = _decompose_utc(timestamps)
    return jnp.concatenate(
        [jnp.take(tables[0], yi, axis=0),
         jnp.take(tables[1], mi, axis=0),
         jnp.take(tables[2], di, axis=0),
         jnp.take(tables[3], hi, axis=0)], axis=-1)


# ----------------------------- main ------------------------------------------
if __name__ == "__main__":
    key = jax.random.PRNGKey(0)
    k_tab, k_ts, k_ts2 = jax.random.split(key, 3)

    tables = init_tables(k_tab)
    fused_tab = fuse_tables(tables)          # once at init, not per forward

    fwd = jax.jit(timestamp_embedding, static_argnames=("block_b",))

    # --- small batch (matches the module's scalar-per-sample usage) ---------
    batch = 8
    # deterministic unix timestamps between 2000-01-01 and ~2038 (int32 safe)
    timestamps = jax.random.randint(
        k_ts, (batch,), 946684800, 2145916800, dtype=jnp.int32)

    out = jax.block_until_ready(fwd(timestamps, fused_tab))

    ref = _reference(tables, timestamps)
    assert out.shape == (batch, D_MODEL)
    assert jnp.allclose(out, ref, atol=1e-6)

    # check the calendar decomposition against Python's datetime (UTC).
    yi, mi, di, hi = _decompose_utc(timestamps)
    for k in range(batch):
        d = datetime.fromtimestamp(int(timestamps[k]), tz=timezone.utc)
        assert int(yi[k]) == d.year - MIN_YEAR
        assert int(mi[k]) == d.month - 1
        assert int(di[k]) == d.weekday()
        assert int(hi[k]) == d.hour

    # --- larger, non-tile-aligned batch: exercises grid > 1 + padding path --
    batch2 = 300
    ts2 = jax.random.randint(
        k_ts2, (batch2,), 946684800, 2145916800, dtype=jnp.int32)
    out2 = jax.block_until_ready(fwd(ts2, fused_tab, block_b=128))
    ref2 = _reference(tables, ts2)
    assert out2.shape == (batch2, D_MODEL)
    assert jnp.allclose(out2, ref2, atol=1e-6)

    print("KERNEL_OK")
</pallas_src>

<mosaic_0001>
module attributes {stable_mosaic.version = 11 : i64} {
  func.func @_tse_kernel(%arg0: i32, %arg1: memref<8x4xi32, #tpu.memory_space<vmem>>, %arg2: memref<128x32xf32, #tpu.memory_space<vmem>>, %arg3: memref<8x32xf32, #tpu.memory_space<vmem>>) attributes {dimension_semantics = [#tpu.dimension_semantics<parallel>], iteration_bounds = array<i64: 1>, scalar_prefetch = 0 : i64, scratch_operands = 0 : i64, tpu.core_type = #tpu.core_type<tc>, window_params = [{transform_indices = @transform_0, window_bounds = array<i64: 8, 4>}, {pipeline_mode = #tpu.pipeline_mode<synchronous>, transform_indices = @transform_1, window_bounds = array<i64: 128, 32>}, {transform_indices = @transform_2, window_bounds = array<i64: 8, 32>}]} {
    %c0 = arith.constant 0 : index
    %c0_0 = arith.constant 0 : index
    %0 = vector.load %arg1[%c0, %c0_0] : memref<8x4xi32, #tpu.memory_space<vmem>>, vector<8x4xi32>
    %1 = tpu.iota {dimensions = array<i32: 1>} : vector<8x128xi32>
    %2 = vector.extract_strided_slice %0 {offsets = [0, 0], sizes = [8, 1], strides = [1, 1]} : vector<8x4xi32> to vector<8x1xi32>
    %3 = vector.broadcast %2 : vector<8x1xi32> to vector<8x128xi32>
    %4 = arith.cmpi eq, %1, %3 : vector<8x128xi32>
    %5 = vector.extract_strided_slice %0 {offsets = [0, 1], sizes = [8, 1], strides = [1, 1]} : vector<8x4xi32> to vector<8x1xi32>
    %6 = vector.broadcast %5 : vector<8x1xi32> to vector<8x128xi32>
    %7 = arith.cmpi eq, %1, %6 : vector<8x128xi32>
    %8 = arith.ori %4, %7 : vector<8x128xi1>
    %9 = vector.extract_strided_slice %0 {offsets = [0, 2], sizes = [8, 1], strides = [1, 1]} : vector<8x4xi32> to vector<8x1xi32>
    %10 = vector.broadcast %9 : vector<8x1xi32> to vector<8x128xi32>
    %11 = arith.cmpi eq, %1, %10 : vector<8x128xi32>
    %12 = arith.ori %8, %11 : vector<8x128xi1>
    %13 = vector.extract_strided_slice %0 {offsets = [0, 3], sizes = [8, 1], strides = [1, 1]} : vector<8x4xi32> to vector<8x1xi32>
    %14 = vector.broadcast %13 : vector<8x1xi32> to vector<8x128xi32>
    %15 = arith.cmpi eq, %1, %14 : vector<8x128xi32>
    %16 = arith.ori %12, %15 : vector<8x128xi1>
    %17 = arith.extui %16 : vector<8x128xi1> to vector<8x128xi32>
    %18 = arith.sitofp %17 : vector<8x128xi32> to vector<8x128xf32>
    %c0_1 = arith.constant 0 : index
    %c0_2 = arith.constant 0 : index
    %19 = vector.load %arg2[%c0_1, %c0_2] : memref<128x32xf32, #tpu.memory_space<vmem>>, vector<128x32xf32>
    %cst = arith.constant dense<0.000000e+00> : vector<8x32xf32>
    %20 = tpu.matmul %18, %19, %cst {dimension_numbers = #tpu.dot_dimension_numbers<[1], [0], [0], [1], [0, 0, 1, 1], [], []>} : vector<8x128xf32>, vector<128x32xf32>, vector<8x32xf32> -> vector<8x32xf32>
    %c0_3 = arith.constant 0 : index
    %c0_4 = arith.constant 0 : index
    %21 = vector.load %arg3[%c0_3, %c0_4] : memref<8x32xf32, #tpu.memory_space<vmem>>, vector<8x32xf32>
    tpu.vector_store %arg3[%c0_3, %c0_4], %20 {strides = array<i32>} : memref<8x32xf32, #tpu.memory_space<vmem>>, vector<8x32xf32>,
    return
  }
  func.func @transform_0(%arg0: i32) -> (i32, i32) {
    %c0_i32 = arith.constant 0 : i32
    %c0_i32_0 = arith.constant 0 : i32
    return %arg0, %c0_i32 : i32, i32
  }
  func.func @transform_1(%arg0: i32) -> (i32, i32) {
    %c0_i32 = arith.constant 0 : i32
    %c0_i32_0 = arith.constant 0 : i32
    %c0_i32_1 = arith.constant 0 : i32
    return %c0_i32, %c0_i32_0 : i32, i32
  }
  func.func @transform_2(%arg0: i32) -> (i32, i32) {
    %c0_i32 = arith.constant 0 : i32
    %c0_i32_0 = arith.constant 0 : i32
    return %arg0, %c0_i32 : i32, i32
  }
}

</mosaic_0001>

<bundles_post_ra>
// kernel: timestamp_embedding.1
= control target key start
LH: loop header
LB: loop body
LE: loop exit
PB: predicated region body
PF: predicated region fallthrough
CT: control target
= control target key end

     0   :  { %v254_v2 = vmov 0   ;;  %v255_v3 = vmov 2   ;;  %v256_v8 = vmov 0.0|0.0   ;;  %v257_v12 = vmov 1   ;;  %s341_s0 = inlined_call_operand.vmem [shape: s32[8,4], index: 0, kind: input, shape index: {}]   ;;  %s342_s1 = inlined_call_operand.vmem [shape: f32[128,32], index: 1, kind: input, shape index: {}]   ;;  %s343_s2 = inlined_call_operand.hbm [shape: f32[8,32], index: 2, kind: output, shape index: {}]  }
   0x1   :  { %v12_v0 = vld [vmem:[%s341_s0] sm:$0xff]  ;;  %225 = vset.pattern.permute.xlu0 %v254_v2  ;;  %227 = vset.pattern.permute.xlu1 %v255_v3  ;;  %v37_v4 = vld [vmem:[%s342_s1 + $0x8] sm:$0xff]  ;;  %v38_v5 = vld [vmem:[%s342_s1 + $0x10] sm:$0xff]  ;;  %v258_v13 = vmov 3  }
   0x2   :  { %v36_v1 = vld [vmem:[%s342_s1] sm:$0xff]  ;;  %v39_v6 = vld [vmem:[%s342_s1 + $0x18] sm:$0xff]  ;;  %16 = vperm.xlu0 %225, %v12_v0   ;;  %25 = vperm.xlu1 %227, %v12_v0   ;;  %v41_v11 = vld [vmem:[%s342_s1 + $0x28] sm:$0xff] }
   0x3   :  { %v193_v7 = vpack.c.bf16 %v37_v4, %v36_v1  ;;  %192 = vmatprep.subr.bf16.mxu0 %v256_v8  ;;  %v196_v9 = vpack.c.bf16 %v39_v6, %v38_v5  ;;  %v40_v10 = vld [vmem:[%s342_s1 + $0x20] sm:$0xff] }
   0x5   :  { %194 = vmatpush3.bf16.msra.mxu0 %v193_v7 }
   0x6   :  { %195 = vmatprep.subr.bf16.mxu0 %v256_v8  ;;  %226 = vset.pattern.permute.xlu0 %v257_v12 }
   0x7   :  { %228 = vset.pattern.permute.xlu1 %v258_v13 }
   0x8   :  { %7 = vsyncpa [#allocation3], 0  ;;  %20 = vperm.xlu0 %226, %v12_v0   ;;  %30 = vperm.xlu1 %228, %v12_v0   ;;  %v199_v14 = vpack.c.bf16 %v41_v11, %v40_v10  ;;  %v42_v15 = vld [vmem:[%s342_s1 + $0x30] sm:$0xff]  ;;  %v43_v16 = vld [vmem:[%s342_s1 + $0x38] sm:$0xff]  ;;  %vm259_vm0 = vmmov 0   ;;  %v260_v17 = vmov 0.0   ;;  %v13_v31 = vlaneseq }
   0x9   :  { %197 = vmatpush3.bf16.msra.mxu0 %v196_v9  ;;  %189 = vmatprep.mubr.msk.f32.mxu0 %vm259_vm0, %v260_v17  ;;  %v202_v18 = vpack.c.bf16 %v43_v16, %v42_v15  ;;  %v44_v19 = vld [vmem:[%s342_s1 + $0x40] sm:$0xff]  ;;  %v45_v20 = vld [vmem:[%s342_s1 + $0x48] sm:$0xff]  ;;  %v46_v22 = vld [vmem:[%s342_s1 + $0x50] sm:$0xff]  ;;  %v261_v37 = vmov 1.0   ;;  %vm122_vm8 = vcmask 261120  }
   0xa   :  { %198 = vmatprep.subr.bf16.mxu0 %v256_v8  ;;  %v205_v21 = vpack.c.bf16 %v45_v20, %v44_v19  ;;  %v47_v23 = vld [vmem:[%s342_s1 + $0x58] sm:$0xff]  ;;  %v48_v25 = vld [vmem:[%s342_s1 + $0x60] sm:$0xff]  ;;  %v49_v26 = vld [vmem:[%s342_s1 + $0x68] sm:$0xff]  ;;  %v14_v34 = vand.u32 127, %v13_v31 }
   0xb   :  { %v208_v24 = vpack.c.bf16 %v47_v23, %v46_v22  ;;  %v211_v27 = vpack.c.bf16 %v49_v26, %v48_v25  ;;  %v50_v28 = vld [vmem:[%s342_s1 + $0x70] sm:$0xff]  ;;  %v51_v29 = vld [vmem:[%s342_s1 + $0x78] sm:$0xff]  ;;  %s262_s1 = smov [#allocation2]  }
   0xc   :  { %229 = vset.pattern.permute.xlu0 %v258_v13  ;;  %v214_v30 = vpack.c.bf16 %v51_v29, %v50_v28  ;;  %s130_s14 = sshll.u32 %s262_s1, 4  ;;  %s131_s14 = int_to_ptr.vmem [resolvable:$true] %s130_s14 }
   0xd   :  { %200 = vmatpush3.bf16.msra.mxu0 %v199_v14  ;;  %s230_s15 = scalar_lea.vmem %s131_s14, 128  ;;  %p235_p1 = scmp.lt.s32.totalorder %s131_s14, %s131_s14 }
   0xe   :  { %201 = vmatprep.subr.bf16.mxu0 %v256_v8  ;;  %p231_p0 = scmp.ne.s32.totalorder %s131_s14, %s230_s15  ;;  %p236_p2 = scmp.lt.s32.totalorder %s230_s15, %s230_s15 }
  0x10   :  { %p237_p3 = por %p236_p2, %p235_p1 }
  0x11   :  { %203 = vmatpush3.bf16.msra.mxu0 %v202_v18 }
  0x12   :  { %204 = vmatprep.subr.bf16.mxu0 %v256_v8  ;;  %p238_p4 = pnand %p237_p3, %p231_p0 }
  0x15   :  { %206 = vmatpush3.bf16.msra.mxu0 %v205_v21 }
  0x16   :  { %207 = vmatprep.subr.bf16.mxu0 %v256_v8 }
  0x19   :  { %209 = vmatpush3.bf16.msra.mxu0 %v208_v24 }
  0x1a   :  { %210 = vmatprep.subr.bf16.mxu0 %v256_v8 }
  0x1d   :  { %212 = vmatpush3.bf16.msra.mxu0 %v211_v27 }
  0x1e   :  { %213 = vmatprep.subr.bf16.mxu0 %v256_v8 }
  0x21   :  { %215 = vmatpush3.bf16.msra.mxu0 %v214_v30 }
  0x81   :  { %v17_v32 = vpop.permute.xlu0 %16  ;;  %v26_v33 = vpop.permute.xlu1 %25 }
  0x82   :  { %vm18_vm1 = vcmp.eq.s32.totalorder %v14_v34, %v17_v32  ;;  %vm27_vm4 = vcmp.eq.s32.totalorder %v14_v34, %v26_v33 }
  0x87   :  { %v21_v35 = vpop.permute.xlu0 %20  ;;  %v31_v36 = vpop.permute.xlu1 %30 }
  0x88   :  { %vm22_vm2 = vcmp.eq.s32.totalorder %v14_v34, %v21_v35  ;;  %vm32_vm3 = vcmp.eq.s32.totalorder %v14_v34, %v31_v36 }
  0x89   :  { %vm23_vm5 = vmor %vm18_vm1, %vm22_vm2 }
  0x8a   :  { %vm28_vm6 = vmor %vm23_vm5, %vm27_vm4 }
  0x8b   :  { %vm33_vm7 = vmor %vm28_vm6, %vm32_vm3 }
  0x8c   :  { %190 = vmatmul.mubr.msk.f32.vlgmr.msra.gmra.mrb[0].mxu0 %vm33_vm7, %v261_v37 }
 0x15f   :  { %v118_v38 = vpop.f32.mrb[0].mxu0 }
 0x160   :  { %123 = vst.msk [vmem:[#allocation2] sm:$0xff] %vm122_vm8, %v118_v38  ;;  %v191_v39 = vpop.f32.mrb[1].mxu0 }
 0x161   :  { %241 = shalt.err (!%p238_p4)
}
 0x162   :  { %s242_s18 = scalar_lea.hbm %s343_s2, 128 }
 0x163   :  { %p243_p5 = scmp.ne.s32.totalorder %s343_s2, %s242_s18  ;;  %p246_p6 = scmp.lt.u32.totalorder %s242_s18, %s343_s2 }
 0x165   :  { %p248_p7 = pnand %p246_p6, %p243_p5 }
 0x167   :  { %251 = shalt.err (!%p248_p7)
}
 0x168   :  { %133 = dma.vmem_to_hbm [thread:$0]  %s131_s14, 128, %s343_s2, [#allocation3]  }
 0x169   :  { %252 = dma.done.wait [#allocation3], 128  }
 0x16a   :  { %253 = vsyncadd [#allocation3], 4294967168 }
 0x16b   :  { %137 = vsyncpa [#allocation3], 1 }

</bundles_post_ra>
